<compile_context>
chip_gen: v6e
topology: v6e:2x2x1
jax: 0.10.0
libtpu: 0.0.40
codegen_flags: <defaults>
</compile_context>

<pallas_src>
import functools

import jax
import jax.numpy as jnp
from jax.experimental import pallas as pl
from jax.experimental.pallas import tpu as pltpu


def _round_up(x, m):
    return (x + m - 1) // m * m


def _pick_row_tile(total_rows, cap):
    """Largest multiple of 8 that divides total_rows and is <= cap."""
    cap = max(8, min(cap, total_rows))
    cap -= cap % 8
    best = 8
    for t in range(8, cap + 1, 8):
        if total_rows % t == 0:
            best = t
    return best


# ----------------------------------------------------------------------------
# Pass 1: conv (per-tap matmuls, no im2col) + pre-BN y + per-batch stats.
# ----------------------------------------------------------------------------
def _conv_stats_kernel(x_ref, w_ref, y_ref, stats_ref, *, kh, kw, stride,
                       ho, wo, cin, howo_pad):
    # x_ref:     (Hp, Wp, Cin)        padded NHWC image for this batch element
    # w_ref:     (kh*kw, Cin, Coutp)  per-tap weight blocks (Cout lane-padded)
    # y_ref:     (howo_pad, Coutp)    pre-BN conv output (lane-dense store)
    # stats_ref: (2, Coutp)           per-batch [sum; sum_of_squares]
    howo = ho * wo
    acc = None
    for i in range(kh):
        for j in range(kw):
            if stride == 1:
                win = x_ref[i:i + ho, j:j + wo, :]
            else:
                win = x_ref[pl.ds(i, ho, stride), pl.ds(j, wo, stride), :]
            # Collapse (ho, wo, Cin) -> (ho*wo, Cin); with wo a multiple of 8
            # this is a pure re-tiling (no intra-vreg data movement).
            pat = win.reshape(howo, cin)
            tap = jnp.dot(pat, w_ref[i * kw + j],
                          preferred_element_type=jnp.float32)
            acc = tap if acc is None else acc + tap

    y_ref[0:howo, :] = acc.astype(y_ref.dtype)
    if howo_pad != howo:  # static; zero the padded tail rows (dropped later)
        y_ref[howo:howo_pad, :] = jnp.zeros(
            (howo_pad - howo, acc.shape[1]), y_ref.dtype)

    # Two row stores (no concat / sublane relayout).  Only real pixels are in
    # acc, so the moments are exact; the true pixel count is applied outside.
    stats_ref[0:1, :] = jnp.sum(acc, axis=0, keepdims=True)
    stats_ref[1:2, :] = jnp.sum(acc * acc, axis=0, keepdims=True)


# ----------------------------------------------------------------------------
# Pass 2: elementwise BatchNorm (pre-folded scale/shift) + Hardswish.
# ----------------------------------------------------------------------------
def _bn_hw_kernel(y_ref, scale_ref, shift_ref, out_ref):
    z = y_ref[...] * scale_ref[...] + shift_ref[...]
    # Hardswish: x * relu6(x + 3) / 6
    out_ref[...] = z * jnp.clip(z + 3.0, 0.0, 6.0) * (1.0 / 6.0)


def conv_bn_hw_forward(x_nchw, w, gamma, beta, stride=1, padding=0, *,
                       row_tile=1024, mxu_dtype=None):
    """x_nchw: (N, Cin, H, W); w: (Cout, Cin, kh, kw); gamma/beta: (Cout,)."""
    n, cin, h, wd = x_nchw.shape
    cout, cin_w, kh, kw = w.shape
    assert cin_w == cin and stride >= 1

    ho = (h + 2 * padding - kh) // stride + 1
    wo = (wd + 2 * padding - kw) // stride + 1
    howo = ho * wo
    howo_pad = _round_up(howo, 8)
    lane = 128
    coutp = _round_up(cout, lane)          # lane-dense stores throughout
    m_real = n * howo
    m_pad = n * howo_pad

    compute_dtype = jnp.float32 if mxu_dtype is None else mxu_dtype

    # NCHW -> NHWC so channels land on the lane dim, then spatial zero-pad.
    # TODO(synk): when chaining Conv_BN_HW blocks keep the whole pipeline NHWC
    # and drop these boundary transposes (each is an HBM round-trip of the
    # activation); kept only because the module's external I/O is NCHW.
    x_nhwc = jnp.transpose(x_nchw, (0, 2, 3, 1)).astype(compute_dtype)
    if padding:
        x_nhwc = jnp.pad(
            x_nhwc, ((0, 0), (padding, padding), (padding, padding), (0, 0)))
    hp, wp = x_nhwc.shape[1], x_nhwc.shape[2]

    # (Cout, Cin, kh, kw) -> (kh*kw, Cin, Coutp): one (Cin, Coutp) block per
    # conv tap, matching the in-kernel tap loop order (i*kw + j).
    w_taps = jnp.transpose(w, (2, 3, 1, 0)).reshape(kh * kw, cin, cout)
    w_taps = jnp.pad(w_taps, ((0, 0), (0, 0), (0, coutp - cout)))
    w_taps = w_taps.astype(compute_dtype)

    gamma_p = jnp.pad(gamma.astype(jnp.float32), (0, coutp - cout),
                      constant_values=1.0)
    beta_p = jnp.pad(beta.astype(jnp.float32), (0, coutp - cout))

    vmem_limit = 32 * 1024 * 1024
    itemsize = jnp.dtype(compute_dtype).itemsize

    # ---- Pass 1: conv + per-batch stats (batch axis parallel => megacore) ---
    p1_flops = 2 * m_real * (kh * kw * cin) * coutp
    p1_bytes = (x_nhwc.size * itemsize + w_taps.size * itemsize
                + m_pad * coutp * 4 + n * 2 * coutp * 4)
    y2d, stats = pl.pallas_call(
        functools.partial(_conv_stats_kernel, kh=kh, kw=kw, stride=stride,
                          ho=ho, wo=wo, cin=cin, howo_pad=howo_pad),
        out_shape=(jax.ShapeDtypeStruct((m_pad, coutp), jnp.float32),
                   jax.ShapeDtypeStruct((n, 2, coutp), jnp.float32)),
        grid=(n,),
        in_specs=[pl.BlockSpec((None, hp, wp, cin), lambda b: (b, 0, 0, 0)),
                  pl.BlockSpec((kh * kw, cin, coutp), lambda b: (0, 0, 0))],
        out_specs=(pl.BlockSpec((howo_pad, coutp), lambda b: (b, 0)),
                   pl.BlockSpec((None, 2, coutp), lambda b: (b, 0, 0))),
        compiler_params=pltpu.CompilerParams(
            dimension_semantics=("parallel",),
            vmem_limit_bytes=vmem_limit),
        cost_estimate=pl.CostEstimate(flops=p1_flops, transcendentals=0,
                                      bytes_accessed=p1_bytes),
    )(x_nhwc, w_taps)

    # ---- Fold BN into scale/shift once (tiny XLA op on (2, Coutp)) ----------
    stats_sum = jnp.sum(stats, axis=0)              # combine per-batch partials
    inv_m = 1.0 / float(m_real)
    mean = stats_sum[0] * inv_m
    # NOTE: E[x^2] - E[x]^2 in f32; fine at these sizes.  TODO(synk): switch to
    # Welford-style / centered partial combination for very large N*Ho*Wo or
    # activations with large mean-to-std ratio.
    var = jnp.maximum(stats_sum[1] * inv_m - mean * mean, 0.0)
    inv_std = jax.lax.rsqrt(var + 1e-5)
    scale = (gamma_p * inv_std).reshape(1, coutp)
    shift = (beta_p - mean * gamma_p * inv_std).reshape(1, coutp)

    # ---- Pass 2: elementwise BN + Hardswish over large row tiles ------------
    tm = _pick_row_tile(m_pad, row_tile)
    p2_flops = 6 * m_pad * coutp
    p2_bytes = 2 * m_pad * coutp * 4 + 2 * coutp * 4
    out2d = pl.pallas_call(
        _bn_hw_kernel,
        out_shape=jax.ShapeDtypeStruct((m_pad, coutp), jnp.float32),
        grid=(m_pad // tm,),
        in_specs=[pl.BlockSpec((tm, coutp), lambda i: (i, 0)),
                  pl.BlockSpec((1, coutp), lambda i: (0, 0)),
                  pl.BlockSpec((1, coutp), lambda i: (0, 0))],
        out_specs=pl.BlockSpec((tm, coutp), lambda i: (i, 0)),
        compiler_params=pltpu.CompilerParams(
            dimension_semantics=("parallel",),
            vmem_limit_bytes=vmem_limit),
        cost_estimate=pl.CostEstimate(flops=p2_flops, transcendentals=0,
                                      bytes_accessed=p2_bytes),
    )(y2d, scale, shift)

    out = out2d.reshape(n, howo_pad, coutp)[:, :howo, :cout]
    out = out.reshape(n, ho, wo, cout)
    return jnp.transpose(out, (0, 3, 1, 2))          # NHWC -> NCHW


def reference_forward(x_nchw, w, gamma, beta, stride=1, padding=0):
    """Plain-JAX reference mirroring the PyTorch module (training-mode BN)."""
    y = jax.lax.conv_general_dilated(
        x_nchw, w, (stride, stride),
        [(padding, padding), (padding, padding)],
        dimension_numbers=("NCHW", "OIHW", "NCHW"))
    mean = y.mean(axis=(0, 2, 3), keepdims=True)
    var = ((y - mean) ** 2).mean(axis=(0, 2, 3), keepdims=True)
    y = (y - mean) / jnp.sqrt(var + 1e-5)
    y = y * gamma.reshape(1, -1, 1, 1) + beta.reshape(1, -1, 1, 1)
    return y * jnp.clip(y + 3.0, 0.0, 6.0) / 6.0


if __name__ == "__main__":
    N, Cin, H, W = 2, 4, 16, 16
    Cout = 8

    key = jax.random.PRNGKey(0)
    kx, kw1, kw3 = jax.random.split(key, 3)

    x = jax.random.normal(kx, (N, Cin, H, W), dtype=jnp.float32)
    # BN affine defaults of a freshly constructed module: gamma=1, beta=0.
    gamma = jnp.ones((Cout,), dtype=jnp.float32)
    beta = jnp.zeros((Cout,), dtype=jnp.float32)

    # Module defaults: kernel_size=1, stride=1, padding=0.
    w1 = 0.1 * jax.random.normal(kw1, (Cout, Cin, 1, 1), dtype=jnp.float32)
    out1 = jax.block_until_ready(conv_bn_hw_forward(x, w1, gamma, beta, 1, 0))
    ref1 = jax.block_until_ready(reference_forward(x, w1, gamma, beta, 1, 0))
    assert out1.shape == (N, Cout, H, W), out1.shape
    err1 = float(jnp.max(jnp.abs(out1 - ref1)))
    assert err1 < 1e-4, err1

    # Also exercise a 3x3 / padding=1 configuration of the same module.
    w3 = 0.1 * jax.random.normal(kw3, (Cout, Cin, 3, 3), dtype=jnp.float32)
    out3 = jax.block_until_ready(conv_bn_hw_forward(x, w3, gamma, beta, 1, 1))
    ref3 = jax.block_until_ready(reference_forward(x, w3, gamma, beta, 1, 1))
    assert out3.shape == (N, Cout, H, W), out3.shape
    err3 = float(jnp.max(jnp.abs(out3 - ref3)))
    assert err3 < 1e-4, err3

    print("KERNEL_OK")
</pallas_src>

<mosaic_0001>
module attributes {stable_mosaic.version = 11 : i64} {
  func.func @_conv_stats_kernel(%arg0: i32, %arg1: memref<1x16x16x4xf32, #tpu.memory_space<vmem>>, %arg2: memref<1x4x128xf32, #tpu.memory_space<vmem>>, %arg3: memref<256x128xf32, #tpu.memory_space<vmem>>, %arg4: memref<1x2x128xf32, #tpu.memory_space<vmem>>) attributes {dimension_semantics = [#tpu.dimension_semantics<parallel>], iteration_bounds = array<i64: 2>, scalar_prefetch = 0 : i64, scratch_operands = 0 : i64, tpu.core_type = #tpu.core_type<tc>, window_params = [{transform_indices = @transform_0, window_bounds = array<i64: 1, 16, 16, 4>}, {pipeline_mode = #tpu.pipeline_mode<synchronous>, transform_indices = @transform_1, window_bounds = array<i64: 1, 4, 128>}, {transform_indices = @transform_2, window_bounds = array<i64: 256, 128>}, {transform_indices = @transform_3, window_bounds = array<i64: 1, 2, 128>}]} {
    %c0 = arith.constant 0 : index
    %c0_0 = arith.constant 0 : index
    %c0_1 = arith.constant 0 : index
    %c0_2 = arith.constant 0 : index
    %0 = vector.load %arg1[%c0, %c0_0, %c0_1, %c0_2] : memref<1x16x16x4xf32, #tpu.memory_space<vmem>>, vector<1x16x16x4xf32>
    %1 = vector.shape_cast %0 : vector<1x16x16x4xf32> to vector<16x16x4xf32>
    %2 = vector.shape_cast %1 : vector<16x16x4xf32> to vector<256x4xf32>
    %c0_3 = arith.constant 0 : index
    %c0_4 = arith.constant 0 : index
    %c0_5 = arith.constant 0 : index
    %3 = vector.load %arg2[%c0_3, %c0_4, %c0_5] : memref<1x4x128xf32, #tpu.memory_space<vmem>>, vector<1x4x128xf32>
    %4 = vector.shape_cast %3 : vector<1x4x128xf32> to vector<4x128xf32>
    %cst = arith.constant dense<0.000000e+00> : vector<256x128xf32>
    %5 = tpu.matmul %2, %4, %cst {dimension_numbers = #tpu.dot_dimension_numbers<[1], [0], [0], [1], [0, 0, 1, 1], [], []>} : vector<256x4xf32>, vector<4x128xf32>, vector<256x128xf32> -> vector<256x128xf32>
    %c0_6 = arith.constant 0 : index
    %c0_7 = arith.constant 0 : index
    %6 = vector.load %arg3[%c0_6, %c0_7] : memref<256x128xf32, #tpu.memory_space<vmem>>, vector<256x128xf32>
    tpu.vector_store %arg3[%c0_6, %c0_7], %5 {strides = array<i32>} : memref<256x128xf32, #tpu.memory_space<vmem>>, vector<256x128xf32>,
    %cst_8 = arith.constant dense<0.000000e+00> : vector<128xf32>
    %7 = vector.multi_reduction <add>, %5, %cst_8 [0] : vector<256x128xf32> to vector<128xf32>
    %8 = vector.shape_cast %7 : vector<128xf32> to vector<1x128xf32>
    %c0_9 = arith.constant 0 : index
    %c0_10 = arith.constant 0 : index
    %c0_11 = arith.constant 0 : index
    %9 = vector.load %arg4[%c0_9, %c0_10, %c0_11] : memref<1x2x128xf32, #tpu.memory_space<vmem>>, vector<1x1x128xf32>
    %10 = vector.shape_cast %9 : vector<1x1x128xf32> to vector<1x128xf32>
    %11 = vector.shape_cast %8 : vector<1x128xf32> to vector<1x1x128xf32>
    tpu.vector_store %arg4[%c0_9, %c0_10, %c0_11], %11 {strides = array<i32>} : memref<1x2x128xf32, #tpu.memory_space<vmem>>, vector<1x1x128xf32>,
    %12 = arith.mulf %5, %5 : vector<256x128xf32>
    %cst_12 = arith.constant dense<0.000000e+00> : vector<128xf32>
    %13 = vector.multi_reduction <add>, %12, %cst_12 [0] : vector<256x128xf32> to vector<128xf32>
    %14 = vector.shape_cast %13 : vector<128xf32> to vector<1x128xf32>
    %c0_13 = arith.constant 0 : index
    %c1 = arith.constant 1 : index
    %c0_14 = arith.constant 0 : index
    %15 = vector.load %arg4[%c0_13, %c1, %c0_14] : memref<1x2x128xf32, #tpu.memory_space<vmem>>, vector<1x1x128xf32>
    %16 = vector.shape_cast %15 : vector<1x1x128xf32> to vector<1x128xf32>
    %17 = vector.shape_cast %14 : vector<1x128xf32> to vector<1x1x128xf32>
    tpu.vector_store %arg4[%c0_13, %c1, %c0_14], %17 {strides = array<i32>} : memref<1x2x128xf32, #tpu.memory_space<vmem>>, vector<1x1x128xf32>,
    return
  }
  func.func @transform_0(%arg0: i32) -> (i32, i32, i32, i32) {
    %c0_i32 = arith.constant 0 : i32
    %c0_i32_0 = arith.constant 0 : i32
    %c0_i32_1 = arith.constant 0 : i32
    %c0_i32_2 = arith.constant 0 : i32
    return %arg0, %c0_i32, %c0_i32_0, %c0_i32_1 : i32, i32, i32, i32
  }
  func.func @transform_1(%arg0: i32) -> (i32, i32, i32) {
    %c0_i32 = arith.constant 0 : i32
    %c0_i32_0 = arith.constant 0 : i32
    %c0_i32_1 = arith.constant 0 : i32
    %c0_i32_2 = arith.constant 0 : i32
    return %c0_i32, %c0_i32_0, %c0_i32_1 : i32, i32, i32
  }
  func.func @transform_2(%arg0: i32) -> (i32, i32) {
    %c0_i32 = arith.constant 0 : i32
    %c0_i32_0 = arith.constant 0 : i32
    return %arg0, %c0_i32 : i32, i32
  }
  func.func @transform_3(%arg0: i32) -> (i32, i32, i32) {
    %c0_i32 = arith.constant 0 : i32
    %c0_i32_0 = arith.constant 0 : i32
    %c0_i32_1 = arith.constant 0 : i32
    return %arg0, %c0_i32, %c0_i32_0 : i32, i32, i32
  }
}

</mosaic_0001>

<bundles_post_ra>
// kernel: tpu_custom_call.1
= control target key start
LH: loop header
LB: loop body
LE: loop exit
PB: predicated region body
PF: predicated region fallthrough
CT: control target
= control target key end

     0   :  { %9 = vsyncpa [#allocation3], 0  ;;  %s1426_s0 = inlined_call_operand.vmem [shape: f32[2,16,16,4], index: 0, kind: input, shape index: {}]   ;;  %s1427_s1 = inlined_call_operand.vmem [shape: f32[1,4,128], index: 1, kind: input, shape index: {}]   ;;  %s1428_s2 = inlined_call_operand.hbm [shape: f32[512,128], index: 2, kind: output, shape index: {0}]   ;;  %s1429_s3 = inlined_call_operand.hbm [shape: f32[2,2,128], index: 3, kind: output, shape index: {1}]  }
   0x1   :  { %11 = vsyncpa [#allocation3 + $0x1], 0 }
   0x2   :  { %12 = vsyncpa [#allocation5], 0 }
   0x3   :  { %14 = vsyncpa [#allocation5 + $0x1], 0  ;;  %s1103_s12 = smov 0   ;;  %s1105_s13 = smov 0  }
   0x4   :  { %s1107_s14 = smov 0   ;;  %s1109_s15 = smov 0  }
   0x5 LB: > { %s1124_s16 = sadd.s32 4294967295, %s1077_s15   ;;  %s806_s17 = sadd.s32 4294967294, %s1077_s15   ;;  %s1077_s15 = sphi %s1109_s15, %s1435_s15   ;;  %s1073_s14 = sphi %s1107_s14, %s1434_s14   ;;  %s1069_s13 = sphi %s1105_s13, %s1433_s13   ;;  %s1065_s12 = sphi %s1103_s12, %s1432_s12  }
   0x6   : > { %s1128_s18 = sadd.s32 1, %s1077_s15   ;;  %s74_s19 = sadd.s32 1, %s1073_s14 }
   0x7   : > { %s71_s20 = ssub.s32 %s1077_s15, %s1128_s18  ;;  %p84_p0 = scmp.ne.s32.totalorder %s1073_s14, %s1069_s13 }
   0x8   : > { %p72_p1 = scmp.eq.s32.totalorder %s71_s20, 0  ;;  %p85_p2 = scmp.eq.s32.totalorder %s1124_s16, 1 }
   0x9   : > { %p90_p3 = scmp.ne.s32.totalorder %s1069_s13, %s1065_s12  ;;  %p91_p4 = scmp.eq.s32.totalorder %s806_s17, 1 }
   0xa   : > { %s1139_s21 = scalar_select %p72_p1, %s1073_s14, %s74_s19  }
   0xb   : > { %p1141_p5 = por %p85_p2, %p84_p0  ;;  %p1145_p6 = por %p91_p4, %p90_p3 }
   0xc   : > { %p809_p7 = scmp.ge.s32.totalorder %s1077_s15, 1  ;;  %p146_p8 = scmp.lt.s32.totalorder %s1077_s15, 3 }
   0xe   : > { %p147_p9 = pnand %p809_p7, %p146_p8 }
   0xf   : > { %p175_p10 = scmp.lt.s32.totalorder (!%p147_p9), %s1124_s16, 1  ;;  %s1226_s4 = sand.u32 (!%p147_p9), 1, %s1069_s13  }
  0x10   : > { %150 = sbr.rel (%p147_p9) target bundleno = 323 (0x143), region = 28  ;;  %s810_s5 = sshll.u32 (!%p147_p9), %s1226_s4, 8 }
  0x11   : > { %s1229_s6 = scalar_lea.vmem (!%p147_p9), [#allocation2], %s810_s5  ;;  %s855_s7 = sshll.u32 (!%p147_p9), %s1124_s16, 12 }
  0x12   : > { %s699_s8 = sshll.u32 (!%p147_p9), %s1229_s6, 4  ;;  %s1310_s11 = scalar_lea.hbm (!%p147_p9), %s1428_s2, %s855_s7  ;;  %s1312_s8 = int_to_ptr.vmem [resolvable:$true] %s699_s8 }
  0x13   : > { %s681_s17 = scalar_lea.sflag (!%p147_p9), [#allocation3], %s1226_s4  ;;  %s987_s19 = scalar_lea.vmem (!%p147_p9), %s1312_s8, 4096 }
  0x14   : > { %p988_p11 = scmp.ne.s32.totalorder (!%p147_p9), %s1312_s8, %s987_s19  ;;  %s1079_s20 = smov (!%p147_p9), [#allocation2]  }
  0x15   : > { %v213_v0 = vld [vmem:[%s1427_s1] sm:$0xf]  ;;  %vm311_vm0 = vcmask 1043456   ;;  %s176_s26 = scalar_select %p175_p10, %s1124_s16, 1  ;;  %vm214_vm1 = vcmask 31744  }
  0x16   : > { %889 = vmatprep.subr.msk.mxu0 %vm311_vm0, %v213_v0  ;;  %939 = vmatprep.subr.msk.mxu1 %vm311_vm0, %v213_v0  ;;  %p989_p12 = pnand %p988_p11, %p1141_p5  ;;  %s991_s24 = sshll.u32 %s1079_s20, 4  ;;  %s992_s24 = int_to_ptr.vmem [resolvable:$false] %s991_s24 }
  0x17   : > { %890 = vmatpush3.msk.msra.mxu0 %vm311_vm0, %v213_v0  ;;  %940 = vmatpush3.msk.msra.mxu1 %vm311_vm0, %v213_v0  ;;  %s854_s27 = sshll.u32 %s176_s26, 8  ;;  %s993_s25 = scalar_lea.vmem %s992_s24, 8192 }
  0x18   : > { %s1159_s30 = scalar_lea.vmem %s1426_s0, %s854_s27  ;;  %p990_p13 = pneg %p989_p12 }
  0x19   : > { %v181_v1 = vld [vmem:[%s1159_s30] sm:$0xff]  ;;  %v182_v2 = vld [vmem:[%s1159_s30 + $0x8] sm:$0xff]  ;;  %v183_v3 = vld [vmem:[%s1159_s30 + $0x10] sm:$0xff]  ;;  %p994_p0 = scmp.lt.s32.totalorder %s1312_s8, %s992_s24  ;;  %p995_p1 = scmp.lt.s32.totalorder %s993_s25, %s987_s19 }
  0x1a   : > { %891 = vmatprep.mubr.msk.f32.mxu0 %vm214_vm1, %v181_v1  ;;  %v184_v4 = vld [vmem:[%s1159_s30 + $0x18] sm:$0xff]  ;;  %v185_v5 = vld [vmem:[%s1159_s30 + $0x20] sm:$0xff]  ;;  %v198_v7 = vld [vmem:[%s1159_s30 + $0x88] sm:$0xff] }
  0x1b   : > { %892 = vmatmul.mubr.msk.f32.vlgmr.msra.gmra.mxu0 %vm214_vm1, %v182_v2  ;;  %v197_v6 = vld [vmem:[%s1159_s30 + $0x80] sm:$0xff]  ;;  %v199_v8 = vld [vmem:[%s1159_s30 + $0x90] sm:$0xff]  ;;  %v186_v9 = vld [vmem:[%s1159_s30 + $0x28] sm:$0xff]  ;;  %p996_p2 = por %p995_p1, %p994_p0 }
  0x1c   : > { %894 = vmatprep.mubr.msk.f32.mxu0 %vm214_vm1, %v183_v3  ;;  %915 = vmatprep.mubr.msk.f32.mxu1 %vm214_vm1, %v197_v6  ;;  %v187_v10 = vld [vmem:[%s1159_s30 + $0x30] sm:$0xff]  ;;  %v200_v11 = vld [vmem:[%s1159_s30 + $0x98] sm:$0xff]  ;;  %v201_v12 = vld [vmem:[%s1159_s30 + $0xa0] sm:$0xff] }
  0x1d   : > { %916 = vmatmul.mubr.msk.f32.vlgmr.msra.gmra.mxu1 %vm214_vm1, %v198_v7  ;;  %v188_v13 = vld [vmem:[%s1159_s30 + $0x38] sm:$0xff]  ;;  %v189_v14 = vld [vmem:[%s1159_s30 + $0x40] sm:$0xff]  ;;  %v202_v15 = vld [vmem:[%s1159_s30 + $0xa8] sm:$0xff]  ;;  %p997_p3 = pnand %p996_p2, %p990_p13 }
  0x1e   : > { %918 = vmatprep.mubr.msk.f32.mxu1 %vm214_vm1, %v199_v8  ;;  %v203_v16 = vld [vmem:[%s1159_s30 + $0xb0] sm:$0xff]  ;;  %v190_v17 = vld [vmem:[%s1159_s30 + $0x48] sm:$0xff]  ;;  %v204_v19 = vld [vmem:[%s1159_s30 + $0xb8] sm:$0xff] }
  0x1f   : > { %895 = vmatmul.mubr.msk.f32.gmra.mxu0 %vm214_vm1, %v184_v4  ;;  %v191_v18 = vld [vmem:[%s1159_s30 + $0x50] sm:$0xff]  ;;  %v205_v20 = vld [vmem:[%s1159_s30 + $0xc0] sm:$0xff]  ;;  %v192_v21 = vld [vmem:[%s1159_s30 + $0x58] sm:$0xff] }
  0x20   : > { %897 = vmatprep.mubr.msk.f32.mxu0 %vm214_vm1, %v185_v5  ;;  %v193_v22 = vld [vmem:[%s1159_s30 + $0x60] sm:$0xff]  ;;  %v206_v23 = vld [vmem:[%s1159_s30 + $0xc8] sm:$0xff]  ;;  %v207_v24 = vld [vmem:[%s1159_s30 + $0xd0] sm:$0xff] }
  0x21   : > { %919 = vmatmul.mubr.msk.f32.gmra.mxu1 %vm214_vm1, %v200_v11  ;;  %v194_v25 = vld [vmem:[%s1159_s30 + $0x68] sm:$0xff]  ;;  %v195_v26 = vld [vmem:[%s1159_s30 + $0x70] sm:$0xff]  ;;  %v208_v27 = vld [vmem:[%s1159_s30 + $0xd8] sm:$0xff] }
  0x22   : > { %921 = vmatprep.mubr.msk.f32.mxu1 %vm214_vm1, %v201_v12  ;;  %v209_v28 = vld [vmem:[%s1159_s30 + $0xe0] sm:$0xff]  ;;  %v196_v29 = vld [vmem:[%s1159_s30 + $0x78] sm:$0xff]  ;;  %v210_v30 = vld [vmem:[%s1159_s30 + $0xe8] sm:$0xff] }
  0x23   : > { %898 = vmatmul.mubr.msk.f32.gmra.mxu0 %vm214_vm1, %v186_v9  ;;  %v211_v31 = vld [vmem:[%s1159_s30 + $0xf0] sm:$0xff]  ;;  %v212_v32 = vld [vmem:[%s1159_s30 + $0xf8] sm:$0xff] }
  0x24   : > { %900 = vmatprep.mubr.msk.f32.mxu0 %vm214_vm1, %v187_v10 }
  0x25   : > { %922 = vmatmul.mubr.msk.f32.gmra.mxu1 %vm214_vm1, %v202_v15 }
  0x26   : > { %924 = vmatprep.mubr.msk.f32.mxu1 %vm214_vm1, %v203_v16 }
  0x27   : > { %901 = vmatmul.mubr.msk.f32.gmra.mxu0 %vm214_vm1, %v188_v13 }
  0x28   : > { %903 = vmatprep.mubr.msk.f32.mxu0 %vm214_vm1, %v189_v14 }
  0x29   : > { %925 = vmatmul.mubr.msk.f32.gmra.mxu1 %vm214_vm1, %v204_v19 }
  0x2a   : > { %927 = vmatprep.mubr.msk.f32.mxu1 %vm214_vm1, %v205_v20 }
  0x2b   : > { %904 = vmatmul.mubr.msk.f32.gmra.mxu0 %vm214_vm1, %v190_v17 }
  0x2c   : > { %906 = vmatprep.mubr.msk.f32.mxu0 %vm214_vm1, %v191_v18 }
  0x2d   : > { %928 = vmatmul.mubr.msk.f32.gmra.mxu1 %vm214_vm1, %v206_v23 }
  0x2e   : > { %930 = vmatprep.mubr.msk.f32.mxu1 %vm214_vm1, %v207_v24 }
  0x2f   : > { %907 = vmatmul.mubr.msk.f32.gmra.mxu0 %vm214_vm1, %v192_v21 }
  0x30   : > { %909 = vmatprep.mubr.msk.f32.mxu0 %vm214_vm1, %v193_v22 }
  0x31   : > { %931 = vmatmul.mubr.msk.f32.gmra.mxu1 %vm214_vm1, %v208_v27 }
  0x32   : > { %933 = vmatprep.mubr.msk.f32.mxu1 %vm214_vm1, %v209_v28 }
  0x33   : > { %910 = vmatmul.mubr.msk.f32.gmra.mxu0 %vm214_vm1, %v194_v25 }
  0x34   : > { %912 = vmatprep.mubr.msk.f32.mxu0 %vm214_vm1, %v195_v26 }
  0x35   : > { %934 = vmatmul.mubr.msk.f32.gmra.mxu1 %vm214_vm1, %v210_v30 }
  0x36   : > { %936 = vmatprep.mubr.msk.f32.mxu1 %vm214_vm1, %v211_v31 }
  0x37   : > { %913 = vmatmul.mubr.msk.f32.gmra.mxu0 %vm214_vm1, %v196_v29 }
  0x39   : > { %937 = vmatmul.mubr.msk.f32.gmra.mxu1 %vm214_vm1, %v212_v32 }
  0xdb   : > { %v893_v33 = vpop.f32.mrf.mxu0 }
  0xdc   : > { %541 = vst [vmem:[%s1229_s6 + $0x8] sm:$0xff] %v893_v33  ;;  %v611_v37 = vmul.f32 %v893_v33, %v893_v33 }
  0xdd   : > { %v381_v34 = vpop.f32.mrf.mxu0  ;;  %v1234_v39 = vpop.f32.mrf.mxu1 }
  0xde   : > { %540 = vst [vmem:[%s1229_s6] sm:$0xff] %v381_v34  ;;  %v610_v35 = vmul.f32 %v381_v34, %v381_v34  ;;  %v572_v38 = vadd.f32 %v893_v33, %v381_v34  ;;  %557 = vst [vmem:[%s1229_s6 + $0x88] sm:$0xff] %v1234_v39 }
  0xdf   : > { %v896_v36 = vpop.f32.mrf.mxu0  ;;  %v1239_v44 = vpop.f32.mrf.mxu1 }
  0xe0   : > { %543 = vst [vmem:[%s1229_s6 + $0x18] sm:$0xff] %v896_v36  ;;  %v642_v41 = vadd.f32 %v611_v37, %v610_v35  ;;  %556 = vst [vmem:[%s1229_s6 + $0x80] sm:$0xff] %v1239_v44  ;;  %v613_v46 = vmul.f32 %v896_v36, %v896_v36 }
  0xe1   : > { %v391_v40 = vpop.f32.mrf.mxu0  ;;  %v1244_v49 = vpop.f32.mrf.mxu1 }
  0xe2   : > { %542 = vst [vmem:[%s1229_s6 + $0x10] sm:$0xff] %v391_v40  ;;  %v573_v42 = vadd.f32 %v572_v38, %v391_v40  ;;  %v612_v43 = vmul.f32 %v391_v40, %v391_v40  ;;  %559 = vst [vmem:[%s1229_s6 + $0x98] sm:$0xff] %v1244_v49 }
  0xe3   : > { %v899_v45 = vpop.f32.mrf.mxu0  ;;  %v1249_v54 = vpop.f32.mrf.mxu1 }
  0xe4   : > { %v643_v47 = vadd.f32 %v642_v41, %v612_v43  ;;  %545 = vst [vmem:[%s1229_s6 + $0x28] sm:$0xff] %v899_v45  ;;  %v574_v48 = vadd.f32 %v896_v36, %v573_v42  ;;  %558 = vst [vmem:[%s1229_s6 + $0x90] sm:$0xff] %v1249_v54  ;;  %v615_v56 = vmul.f32 %v899_v45, %v899_v45 }
  0xe5   : > { %v401_v50 = vpop.f32.mrf.mxu0  ;;  %v1254_v59 = vpop.f32.mrf.mxu1 }
  0xe6   : > { %544 = vst [vmem:[%s1229_s6 + $0x20] sm:$0xff] %v401_v50  ;;  %v575_v51 = vadd.f32 %v574_v48, %v401_v50  ;;  %v614_v52 = vmul.f32 %v401_v50, %v401_v50  ;;  %v644_v53 = vadd.f32 %v643_v47, %v613_v46  ;;  %561 = vst [vmem:[%s1229_s6 + $0xa8] sm:$0xff] %v1254_v59 }
  0xe7   : > { %v902_v55 = vpop.f32.mrf.mxu0  ;;  %v1259_v0 = vpop.f32.mrf.mxu1  ;;  %v626_v50 = vmul.f32 %v1239_v44, %v1239_v44 }
  0xe8   : > { %v645_v57 = vadd.f32 %v644_v53, %v614_v52  ;;  %547 = vst [vmem:[%s1229_s6 + $0x38] sm:$0xff] %v902_v55  ;;  %v576_v58 = vadd.f32 %v899_v45, %v575_v51  ;;  %560 = vst [vmem:[%s1229_s6 + $0xa0] sm:$0xff] %v1259_v0  ;;  %v617_v2 = vmul.f32 %v902_v55, %v902_v55 }
  0xe9   : > { %v411_v60 = vpop.f32.mrf.mxu0  ;;  %v1264_v5 = vpop.f32.mrf.mxu1  ;;  %v627_v52 = vmul.f32 %v1234_v39, %v1234_v39 }
  0xea   : > { %546 = vst [vmem:[%s1229_s6 + $0x30] sm:$0xff] %v411_v60  ;;  %v577_v61 = vadd.f32 %v576_v58, %v411_v60  ;;  %v616_v62 = vmul.f32 %v411_v60, %v411_v60  ;;  %v646_v63 = vadd.f32 %v645_v57, %v615_v56  ;;  %563 = vst [vmem:[%s1229_s6 + $0xb8] sm:$0xff] %v1264_v5 }
  0xeb   : > { %v905_v1 = vpop.f32.mrf.mxu0  ;;  %v1269_v10 = vpop.f32.mrf.mxu1 }
  0xec   : > { %v647_v3 = vadd.f32 %v646_v63, %v616_v62  ;;  %549 = vst [vmem:[%s1229_s6 + $0x48] sm:$0xff] %v905_v1  ;;  %v578_v4 = vadd.f32 %v902_v55, %v577_v61  ;;  %562 = vst [vmem:[%s1229_s6 + $0xb0] sm:$0xff] %v1269_v10  ;;  %v619_v12 = vmul.f32 %v905_v1, %v905_v1 }
  0xed   : > { %v421_v6 = vpop.f32.mrf.mxu0  ;;  %v1274_v15 = vpop.f32.mrf.mxu1 }
  0xee   : > { %548 = vst [vmem:[%s1229_s6 + $0x40] sm:$0xff] %v421_v6  ;;  %v579_v7 = vadd.f32 %v578_v4, %v421_v6  ;;  %v618_v8 = vmul.f32 %v421_v6, %v421_v6  ;;  %v648_v9 = vadd.f32 %v647_v3, %v617_v2  ;;  %565 = vst [vmem:[%s1229_s6 + $0xc8] sm:$0xff] %v1274_v15 }
  0xef   : > { %v908_v11 = vpop.f32.mrf.mxu0  ;;  %v1279_v20 = vpop.f32.mrf.mxu1 }
  0xf0   : > { %v649_v13 = vadd.f32 %v648_v9, %v618_v8  ;;  %551 = vst [vmem:[%s1229_s6 + $0x58] sm:$0xff] %v908_v11  ;;  %v580_v14 = vadd.f32 %v905_v1, %v579_v7  ;;  %564 = vst [vmem:[%s1229_s6 + $0xc0] sm:$0xff] %v1279_v20  ;;  %v621_v22 = vmul.f32 %v908_v11, %v908_v11 }
  0xf1   : > { %v431_v16 = vpop.f32.mrf.mxu0  ;;  %v1284_v25 = vpop.f32.mrf.mxu1 }
  0xf2   : > { %550 = vst [vmem:[%s1229_s6 + $0x50] sm:$0xff] %v431_v16  ;;  %v581_v17 = vadd.f32 %v580_v14, %v431_v16  ;;  %v620_v18 = vmul.f32 %v431_v16, %v431_v16  ;;  %v650_v19 = vadd.f32 %v649_v13, %v619_v12  ;;  %567 = vst [vmem:[%s1229_s6 + $0xd8] sm:$0xff] %v1284_v25 }
  0xf3   : > { %v911_v21 = vpop.f32.mrf.mxu0  ;;  %v1289_v30 = vpop.f32.mrf.mxu1 }
  0xf4   : > { %v651_v23 = vadd.f32 %v650_v19, %v620_v18  ;;  %553 = vst [vmem:[%s1229_s6 + $0x68] sm:$0xff] %v911_v21  ;;  %v582_v24 = vadd.f32 %v908_v11, %v581_v17  ;;  %566 = vst [vmem:[%s1229_s6 + $0xd0] sm:$0xff] %v1289_v30  ;;  %v623_v32 = vmul.f32 %v911_v21, %v911_v21 }
  0xf5   : > { %v441_v26 = vpop.f32.mrf.mxu0  ;;  %v1294_v35 = vpop.f32.mrf.mxu1 }
  0xf6   : > { %552 = vst [vmem:[%s1229_s6 + $0x60] sm:$0xff] %v441_v26  ;;  %v583_v27 = vadd.f32 %v582_v24, %v441_v26  ;;  %v622_v28 = vmul.f32 %v441_v26, %v441_v26  ;;  %v652_v29 = vadd.f32 %v651_v23, %v621_v22  ;;  %569 = vst [vmem:[%s1229_s6 + $0xe8] sm:$0xff] %v1294_v35 }
  0xf7   : > { %v914_v31 = vpop.f32.mrf.mxu0  ;;  %v1301_v41 = vpop.f32.mrf.mxu1 }
  0xf8   : > { %v653_v33 = vadd.f32 %v652_v29, %v622_v28  ;;  %555 = vst [vmem:[%s1229_s6 + $0x78] sm:$0xff] %v914_v31  ;;  %v584_v34 = vadd.f32 %v911_v21, %v583_v27  ;;  %568 = vst [vmem:[%s1229_s6 + $0xe0] sm:$0xff] %v1301_v41  ;;  %v625_v42 = vmul.f32 %v914_v31, %v914_v31 }
  0xf9   : > { %v451_v36 = vpop.f32.mrf.mxu0  ;;  %v1305_v46 = vpop.f32.mrf.mxu1 }
  0xfa   : > { %554 = vst [vmem:[%s1229_s6 + $0x70] sm:$0xff] %v451_v36  ;;  %v585_v37 = vadd.f32 %v584_v34, %v451_v36  ;;  %v624_v38 = vmul.f32 %v451_v36, %v451_v36  ;;  %v654_v40 = vadd.f32 %v653_v33, %v623_v32  ;;  %571 = vst [vmem:[%s1229_s6 + $0xf8] sm:$0xff] %v1305_v46 }
  0xfb   : > { %v1319_v51 = vpop.f32.mrf.mxu1 }
  0xfc   : > { %v586_v43 = vadd.f32 %v914_v31, %v585_v37  ;;  %v655_v45 = vadd.f32 %v654_v40, %v624_v38  ;;  %570 = vst [vmem:[%s1229_s6 + $0xf0] sm:$0xff] %v1319_v51 }
  0xfe   : > { %v656_v47 = vadd.f32 %v655_v45, %v625_v42  ;;  %v587_v48 = vadd.f32 %v586_v43, %v1239_v44 }
 0x100   : > { %v657_v53 = vadd.f32 %v656_v47, %v626_v50  ;;  %v588_v55 = vadd.f32 %v1234_v39, %v587_v48 }
 0x101   : > { %1000 = shalt.err (!%p997_p3)
}
 0x102   : > { %s1001_s26 = scalar_lea.hbm %s1310_s11, 4096  ;;  %s1005_s29 = scalar_lea.hbm %s1428_s2, 8192 }
 0x103   : > { %p1002_p4 = scmp.ne.s32.totalorder %s1310_s11, %s1001_s26  ;;  %p1006_p9 = scmp.lt.s32.totalorder %s1310_s11, %s1428_s2 }
 0x104   : > { %p1007_p10 = scmp.lt.s32.totalorder %s1005_s29, %s1001_s26 }
 0x105   : > { %p1003_p7 = pnand %p1002_p4, %p1141_p5 }
 0x106   : > { %p1008_p11 = por %p1007_p10, %p1006_p9 }
 0x107   : > { %p1004_p8 = pneg %p1003_p7 }
 0x109   : > { %p1009_p12 = pnand %p1008_p11, %p1004_p8 }
 0x10b   : > { %1012 = shalt.err (!%p1009_p12)
}
 0x10c   : > { %s1080_s6 = smov 128   ;;  %s1081_s7 = smov 8   ;;  %v589_v39 = vadd.f32 %v588_v55, %v1249_v54  ;;  %v628_v44 = vmul.f32 %v1249_v54, %v1249_v54  ;;  %v658_v56 = vadd.f32 %v657_v53, %v627_v52  ;;  %v629_v57 = vmul.f32 %v1244_v49, %v1244_v49 }
 0x10d   : > { %941 = dma.vmem_to_hbm [thread:$0]  (%p1141_p5), %s1312_s8, 4096, %s1310_s11, %s681_s17, %s1080_s6, %s1080_s6, %s1081_s7   ;;  %v630_v62 = vmul.f32 %v1259_v0, %v1259_v0  ;;  %v631_v1 = vmul.f32 %v1254_v59, %v1254_v59  ;;  %v632_v4 = vmul.f32 %v1269_v10, %v1269_v10  ;;  %v634_v9 = vmul.f32 %v1279_v20, %v1279_v20 }
 0x10e   : > { %v659_v58 = vadd.f32 %v658_v56, %v628_v44  ;;  %v590_v60 = vadd.f32 %v1244_v49, %v589_v39  ;;  %v633_v49 = vmul.f32 %v1264_v5, %v1264_v5  ;;  %v636_v14 = vmul.f32 %v1289_v30, %v1289_v30  ;;  %s811_s8 = sshll.u32 %s1226_s4, 1  ;;  %s851_s9 = sshll.u32 %s1124_s16, 5 }
 0x10f   : > { %v640_v26 = vmul.f32 %v1319_v51, %v1319_v51  ;;  %v641_v27 = vmul.f32 %v1305_v46, %v1305_v46  ;;  %s174_s10 = scalar_lea.vmem [#allocation4], %s811_s8  ;;  %s713_s20 = scalar_lea.hbm %s1429_s3, %s851_s9 }
 0x110   : > { %v591_v61 = vadd.f32 %v590_v60, %v1259_v0  ;;  %v660_v63 = vadd.f32 %v659_v58, %v629_v57  ;;  %s715_s11 = sshll.u32 %s174_s10, 4  ;;  %s686_s24 = scalar_lea.sflag [#allocation5], %s1226_s4  ;;  %s716_s11 = int_to_ptr.vmem [resolvable:$true] %s715_s11 }
 0x111   : > { %s1013_s25 = scalar_lea.vmem %s716_s11, 32  ;;  %s1082_s26 = smov [#allocation4]  }
 0x112   : > { %v661_v2 = vadd.f32 %v660_v63, %v630_v62  ;;  %v592_v3 = vadd.f32 %v1254_v59, %v591_v61  ;;  %v635_v59 = vmul.f32 %v1274_v15, %v1274_v15  ;;  %p1014_p13 = scmp.ne.s32.totalorder %s716_s11, %s1013_s25  ;;  %s1017_s16 = sshll.u32 %s1082_s26, 4  ;;  %s1018_s16 = int_to_ptr.vmem [resolvable:$false] %s1017_s16 }
 0x113   : > { %s1019_s27 = scalar_lea.vmem %s1018_s16, 64  ;;  %p1020_p2 = scmp.lt.s32.totalorder %s716_s11, %s1018_s16 }
 0x114   : > { %v593_v54 = vadd.f32 %v592_v3, %v1269_v10  ;;  %v662_v6 = vadd.f32 %v661_v2, %v631_v1  ;;  %p1015_p0 = pnand %p1014_p13, %p1141_p5  ;;  %p1021_p3 = scmp.lt.s32.totalorder %s1019_s27, %s1013_s25 }
 0x116   : > { %v663_v7 = vadd.f32 %v662_v6, %v632_v4  ;;  %v594_v8 = vadd.f32 %v1264_v5, %v593_v54  ;;  %v637_v5 = vmul.f32 %v1284_v25, %v1284_v25  ;;  %p1016_p1 = pneg %p1015_p0  ;;  %p1022_p4 = por %p1021_p3, %p1020_p2 }
 0x118   : > { %v595_v0 = vadd.f32 %v594_v8, %v1279_v20  ;;  %v664_v11 = vadd.f32 %v663_v7, %v633_v49  ;;  %v638_v20 = vmul.f32 %v1301_v41, %v1301_v41  ;;  %p1023_p7 = pnand %p1022_p4, %p1016_p1 }
 0x11a   : > { %v665_v12 = vadd.f32 %v664_v11, %v634_v9  ;;  %v596_v13 = vadd.f32 %v1274_v15, %v595_v0  ;;  %v639_v15 = vmul.f32 %v1294_v35, %v1294_v35 }
 0x11c   : > { %v597_v10 = vadd.f32 %v596_v13, %v1289_v30  ;;  %v666_v16 = vadd.f32 %v665_v12, %v635_v59 }
 0x11e   : > { %v667_v17 = vadd.f32 %v666_v16, %v636_v14  ;;  %v598_v18 = vadd.f32 %v1284_v25, %v597_v10 }
 0x120   : > { %v599_v19 = vadd.f32 %v598_v18, %v1301_v41  ;;  %v668_v21 = vadd.f32 %v667_v17, %v637_v5 }
 0x122   : > { %v669_v22 = vadd.f32 %v668_v21, %v638_v20  ;;  %v600_v23 = vadd.f32 %v1294_v35, %v599_v19 }
 0x124   : > { %v601_v24 = vadd.f32 %v600_v23, %v1319_v51  ;;  %v670_v25 = vadd.f32 %v669_v22, %v639_v15 }
 0x126   : > { %v602_v28 = vadd.f32 %v1305_v46, %v601_v24  ;;  %v671_v29 = vadd.f32 %v670_v25, %v640_v26 }
 0x128   : > { %v603_v30 = vrot.slane %v602_v28, 4  ;;  %v672_v31 = vadd.f32 %v671_v29, %v641_v27 }
 0x12a   : > { %v604_v32 = vadd.f32 %v603_v30, %v602_v28  ;;  %v673_v33 = vrot.slane %v672_v31, 4 }
 0x12c   : > { %v605_v34 = vrot.slane %v604_v32, 2  ;;  %v674_v35 = vadd.f32 %v673_v33, %v672_v31 }
 0x12e   : > { %v606_v36 = vadd.f32 %v605_v34, %v604_v32  ;;  %v675_v37 = vrot.slane %v674_v35, 2 }
 0x130   : > { %v607_v38 = vrot.slane %v606_v36, 1  ;;  %v676_v40 = vadd.f32 %v675_v37, %v674_v35 }
 0x132   : > { %v608_v41 = vadd.f32 %v607_v38, %v606_v36  ;;  %v677_v42 = vrot.slane %v676_v40, 1 }
 0x134   : > { %609 = vst [vmem:[%s174_s10] sm:$0x1] %v608_v41  ;;  %v678_v43 = vadd.f32 %v677_v42, %v676_v40 }
 0x136   : > { %679 = vst [vmem:[%s174_s10 + $0x1] sm:$0x1] %v678_v43 }
 0x137   : > { %1026 = shalt.err (!%p1023_p7)
}
 0x138   : > { %s1027_s28 = scalar_lea.hbm %s713_s20, 32  ;;  %s1031_s30 = scalar_lea.hbm %s1429_s3, 64 }
 0x139   : > { %p1028_p8 = scmp.ne.s32.totalorder %s713_s20, %s1027_s28  ;;  %p1032_p11 = scmp.lt.s32.totalorder %s713_s20, %s1429_s3 }
 0x13a   : > { %p1033_p12 = scmp.lt.s32.totalorder %s1031_s30, %s1027_s28 }
 0x13b   : > { %p1029_p9 = pnand %p1028_p8, %p1141_p5 }
 0x13c   : > { %p1034_p13 = por %p1033_p12, %p1032_p11 }
 0x13d   : > { %p1030_p10 = pneg %p1029_p9 }
 0x13f   : > { %p1035_p0 = pnand %p1034_p13, %p1030_p10 }
 0x141   : > { %1038 = shalt.err (!%p1035_p0)
}
 0x142   : > { %942 = dma.vmem_to_hbm [thread:$0]  (%p1141_p5), %s716_s11, 32, %s713_s20, %s686_s24  }
 0x143 PF: > { %p952_p1 = scmp.ge.s32.totalorder %s1077_s15, 2  ;;  %s727_s7 = sand.u32 1, %s1065_s12  }
 0x144   : > { %s728_s8 = scalar_lea.sflag [#allocation3], %s727_s7 }
 0x145   : > { %p946_p2 = pnand %p952_p1, %p1145_p6 }
 0x147   : > { %p947_p3 = pneg %p946_p2 }
 0x149   : > { %1056 = dma.done.wait (%p947_p3), %s728_s8, 4096  }
 0x14a   : > { %1058 = vsyncadd (%p947_p3), %s728_s8, 4294963200  ;;  %s737_s9 = scalar_lea.sflag [#allocation5], %s727_s7 }
 0x14b   : > { %1060 = dma.done.wait (%p947_p3), %s737_s9, 32  }
 0x14c   : > { %1062 = vsyncadd (%p947_p3), %s737_s9, 4294967264  ;;  %p17_p5 = scmp.ge.s32.totalorder %s1128_s18, 4   ;;  %s1432_s12 = smov %s1069_s13 }
 0x14d   : > { %s1433_s13 = smov %s1073_s14  ;;  %s1434_s14 = smov %s1139_s21 }
 0x14e   : > { %s1435_s15 = smov %s1128_s18  ;;  %19 = sbr.rel (!%p17_p5) target bundleno = 5 (0x5), region = 80 }
 0x153   :  { %742 = vsyncpa [#allocation3], 1 }
 0x154   :  { %744 = vsyncpa [#allocation3 + $0x1], 1 }
 0x155   :  { %745 = vsyncpa [#allocation5], 1 }
 0x156   :  { %747 = vsyncpa [#allocation5 + $0x1], 1 }

</bundles_post_ra>
